<compile_context>
chip_gen: v6e
topology: v6e:2x2x1
jax: 0.10.0
libtpu: 0.0.40
codegen_flags: <defaults>
</compile_context>

<pallas_src>
import functools

import jax
import jax.numpy as jnp
from jax.experimental import pallas as pl
from jax.experimental.pallas import tpu as pltpu


NS_PAD = 8                        # id columns padded to 8 (sublane-friendly); 5 real streams
_VMEM_BUDGET = 32 * 1024 * 1024   # conservative per-step budget, safe on v5e/v6e/v7x


def _round_up(x, m):
    return ((x + m - 1) // m) * m


# ---------------------------------------------------------------------------
# Kernel
# ---------------------------------------------------------------------------
def encoder_block_kernel(ids_ref, table_ref, out_ref, *, sub_vpads):
    """ids_ref:   (TN, NS_PAD) int32 per-stream LOCAL ids (-1 = padding),
       table_ref: (V_pad, D_pad) bf16 fused table laid out as 128-row-aligned
                  sub-tables in stream order,
       out_ref:   (TN, D_pad) f32 summed embeddings."""
    ids = ids_ref[...]
    tn = ids_ref.shape[0]

    # Each stream's one-hot lives only in its own (static, lane-aligned)
    # column block; concatenating along lanes gives the combined (TN, V_pad)
    # one-hot with no accumulate adds and ~1/5 of the compare work.
    blocks = []
    for s, vpad in enumerate(sub_vpads):                  # static unroll (5)
        iota = jax.lax.broadcasted_iota(jnp.int32, (tn, vpad), 1)
        blocks.append((ids[:, s:s + 1] == iota).astype(jnp.bfloat16))
    onehot = jnp.concatenate(blocks, axis=1)              # (TN, V_pad) bf16

    # Single MXU matmul: bf16 x bf16 -> f32 accumulate.
    out_ref[...] = jnp.dot(
        onehot, table_ref[...],
        preferred_element_type=jnp.float32).astype(out_ref.dtype)


# ---------------------------------------------------------------------------
# Parameters / one-time table preparation
# ---------------------------------------------------------------------------
def init_encoder_block_params(key, n_dims, total_ex, total_cat, total_tag,
                              total_chap, total_test, total_responses, seq_len):
    """Deterministic nn.Embedding-style init (standard normal)."""
    ks = jax.random.split(key, 7)
    return {
        "exercise": jax.random.normal(ks[0], (total_ex, n_dims), jnp.float32),
        "category": jax.random.normal(ks[1], (total_cat, n_dims), jnp.float32),
        "tag":      jax.random.normal(ks[2], (total_tag, n_dims), jnp.float32),
        "chapter":  jax.random.normal(ks[3], (total_chap, n_dims), jnp.float32),
        "test":     jax.random.normal(ks[4], (total_test, n_dims), jnp.float32),
        "position": jax.random.normal(ks[5], (seq_len, n_dims), jnp.float32),
        "response": jax.random.normal(ks[6], (total_responses, n_dims), jnp.float32),
    }


def prepare_fused_table(params, seq_len):
    """Build the fused, padded, bf16 table ONCE (at init / after a parameter
    update). Forward calls never touch the raw embedding tables again."""
    L = seq_len - 1
    tabs = (params["exercise"], params["category"], params["tag"],
            params["response"], params["position"][:L])
    D = tabs[0].shape[1]
    D_pad = _round_up(D, 128)
    sub_vpads = tuple(_round_up(t.shape[0], 128) for t in tabs)
    padded = [jnp.pad(t, ((0, vp - t.shape[0]), (0, D_pad - D)))
              for t, vp in zip(tabs, sub_vpads)]
    # TODO(synk): keep float32 here if bf16 quantization of the embedding
    #             values is unacceptable downstream.
    fused = jnp.concatenate(padded, axis=0).astype(jnp.bfloat16)  # (V_pad, D_pad)
    return jax.device_put(fused), sub_vpads


# ---------------------------------------------------------------------------
# Forward
# ---------------------------------------------------------------------------
def _choose_tile_rows(n, v_pad, d_pad, table_bytes):
    """Largest sublane-aligned row tile fitting the VMEM budget, capped so the
    grid keeps >= 2 steps when there is enough data (v7x: 2 TensorCores)."""
    n_rows = _round_up(max(n, 1), 8)
    per_row = (2 * NS_PAD * 4          # ids, double-buffered int32
               + 2 * d_pad * 4         # output tile, double-buffered f32
               + 2 * v_pad * 2)        # in-kernel one-hot temporaries, bf16
    avail = max(_VMEM_BUDGET - table_bytes, 64 * per_row)
    tn = min(2048, max(8, (avail // per_row) // 8 * 8))
    if n_rows >= 16:
        tn = min(tn, _round_up((n_rows + 1) // 2, 8))
    return min(tn, n_rows)


@functools.partial(jax.jit,
                   static_argnames=("sub_vpads", "n_dims", "seq_len", "first_block"))
def encoder_block_forward(fused_table, input_e, category, tag, chapter, test,
                          response, *, sub_vpads, n_dims, seq_len,
                          first_block=True):
    if not first_block:
        # Matches the torch branch: the input is already the interaction.
        return input_e

    del chapter, test  # looked up in torch but never added to the output

    B, L = input_e.shape
    assert L == seq_len - 1, "position ids follow torch's arange(seq_len - 1)"
    V_pad, D_pad = fused_table.shape
    assert V_pad == sum(sub_vpads)
    N = B * L

    # Packed LOCAL ids: one (N_pad, 8) int32 array; -1 never matches any iota.
    pos_ids = jnp.broadcast_to(jnp.arange(L, dtype=jnp.int32)[None, :], (B, L))
    id_streams = (input_e, category, tag, response, pos_ids)
    ids = jnp.stack([s.astype(jnp.int32).reshape(N) for s in id_streams], axis=1)

    table_bytes = V_pad * D_pad * fused_table.dtype.itemsize
    TN = _choose_tile_rows(N, V_pad, D_pad, table_bytes)
    N_pad = _round_up(N, TN)
    ids = jnp.pad(ids, ((0, N_pad - N), (0, NS_PAD - len(id_streams))),
                  constant_values=-1)                     # (N_pad, 8)

    per_row = 2 * NS_PAD * 4 + 2 * D_pad * 4 + 2 * V_pad * 2
    vmem_limit = int(min(128 << 20,
                         max(32 << 20, table_bytes + TN * per_row + (8 << 20))))

    out = pl.pallas_call(
        functools.partial(encoder_block_kernel, sub_vpads=sub_vpads),
        out_shape=jax.ShapeDtypeStruct((N_pad, D_pad), jnp.float32),
        grid=(N_pad // TN,),
        in_specs=[
            pl.BlockSpec((TN, NS_PAD), lambda i: (i, 0)),        # ids: row-tiled
            pl.BlockSpec((V_pad, D_pad), lambda i: (0, 0),       # table: resident,
                         pipeline_mode=pl.Buffered(1)),          #   single-buffered
        ],
        out_specs=pl.BlockSpec((TN, D_pad), lambda i: (i, 0)),   # lane-dense out
        compiler_params=pltpu.CompilerParams(
            dimension_semantics=("parallel",),
            vmem_limit_bytes=vmem_limit),
    )(ids, fused_table)

    if N_pad != N:
        out = out[:N]
    if D_pad != n_dims:
        out = out[:, :n_dims]
    return out.reshape(B, L, n_dims)


# ---------------------------------------------------------------------------
# Reference & demo
# ---------------------------------------------------------------------------
def _reference_forward(params, input_e, category, tag, response):
    # bf16-quantized tables (same quantization the fused table uses),
    # accumulated in f32 -> matches the kernel up to f32 rounding.
    def q(name):
        return params[name].astype(jnp.bfloat16).astype(jnp.float32)
    L = input_e.shape[1]
    pos = jnp.arange(L)
    return (q("category")[category] + q("tag")[tag] + q("exercise")[input_e]
            + q("response")[response] + q("position")[pos][None, :, :])


if __name__ == "__main__":
    # Small synthetic config
    n_dims = 32
    seq_len = 9            # torch module uses sequences of length seq_len - 1 = 8
    L = seq_len - 1
    batch = 2
    total_ex, total_cat, total_tag = 32, 16, 16
    total_chap, total_test, total_responses = 8, 8, 4

    key = jax.random.PRNGKey(0)
    pkey, *ikeys = jax.random.split(key, 7)

    params = init_encoder_block_params(
        pkey, n_dims, total_ex, total_cat, total_tag,
        total_chap, total_test, total_responses, seq_len)

    # Built ONCE at init / param-update time; reused by every forward call.
    fused_table, sub_vpads = prepare_fused_table(params, seq_len)

    input_e  = jax.random.randint(ikeys[0], (batch, L), 0, total_ex,        jnp.int32)
    category = jax.random.randint(ikeys[1], (batch, L), 0, total_cat,       jnp.int32)
    tag      = jax.random.randint(ikeys[2], (batch, L), 0, total_tag,       jnp.int32)
    chapter  = jax.random.randint(ikeys[3], (batch, L), 0, total_chap,      jnp.int32)
    test     = jax.random.randint(ikeys[4], (batch, L), 0, total_test,      jnp.int32)
    response = jax.random.randint(ikeys[5], (batch, L), 0, total_responses, jnp.int32)

    out = encoder_block_forward(fused_table, input_e, category, tag, chapter,
                                test, response, sub_vpads=sub_vpads,
                                n_dims=n_dims, seq_len=seq_len, first_block=True)
    out = jax.block_until_ready(out)

    ref = _reference_forward(params, input_e, category, tag, response)
    assert out.shape == (batch, L, n_dims)
    assert jnp.allclose(out, ref, atol=1e-5, rtol=1e-5), "mismatch vs. bf16 reference"

    # Sanity vs. the unquantized f32 tables (loose tolerance: bf16 table).
    ref_f32 = (params["category"][category] + params["tag"][tag]
               + params["exercise"][input_e] + params["response"][response]
               + params["position"][jnp.arange(L)][None, :, :])
    assert jnp.allclose(out, ref_f32, atol=1e-1), "mismatch vs. f32 reference"

    print("KERNEL_OK")
</pallas_src>

<mosaic_0001>
module attributes {stable_mosaic.version = 11 : i64} {
  func.func @encoder_block_kernel(%arg0: i32, %arg1: memref<8x8xi32, #tpu.memory_space<vmem>>, %arg2: memref<640x128xbf16, #tpu.memory_space<vmem>>, %arg3: memref<8x128xf32, #tpu.memory_space<vmem>>) attributes {dimension_semantics = [#tpu.dimension_semantics<parallel>], iteration_bounds = array<i64: 2>, scalar_prefetch = 0 : i64, scratch_operands = 0 : i64, tpu.core_type = #tpu.core_type<tc>, window_params = [{transform_indices = @transform_0, window_bounds = array<i64: 8, 8>}, {pipeline_mode = #tpu.pipeline_mode<synchronous>, transform_indices = @transform_1, window_bounds = array<i64: 640, 128>}, {transform_indices = @transform_2, window_bounds = array<i64: 8, 128>}]} {
    %c0 = arith.constant 0 : index
    %c0_0 = arith.constant 0 : index
    %0 = vector.load %arg1[%c0, %c0_0] : memref<8x8xi32, #tpu.memory_space<vmem>>, vector<8x8xi32>
    %1 = tpu.iota {dimensions = array<i32: 1>} : vector<8x128xi32>
    %2 = vector.extract_strided_slice %0 {offsets = [0, 0], sizes = [8, 1], strides = [1, 1]} : vector<8x8xi32> to vector<8x1xi32>
    %3 = vector.broadcast %2 : vector<8x1xi32> to vector<8x128xi32>
    %4 = arith.cmpi eq, %3, %1 : vector<8x128xi32>
    %5 = arith.extui %4 : vector<8x128xi1> to vector<8x128xi32>
    %6 = arith.sitofp %5 : vector<8x128xi32> to vector<8x128xf32>
    %7 = arith.truncf %6 : vector<8x128xf32> to vector<8x128xbf16>
    %8 = tpu.iota {dimensions = array<i32: 1>} : vector<8x128xi32>
    %9 = vector.extract_strided_slice %0 {offsets = [0, 1], sizes = [8, 1], strides = [1, 1]} : vector<8x8xi32> to vector<8x1xi32>
    %10 = vector.broadcast %9 : vector<8x1xi32> to vector<8x128xi32>
    %11 = arith.cmpi eq, %10, %8 : vector<8x128xi32>
    %12 = arith.extui %11 : vector<8x128xi1> to vector<8x128xi32>
    %13 = arith.sitofp %12 : vector<8x128xi32> to vector<8x128xf32>
    %14 = arith.truncf %13 : vector<8x128xf32> to vector<8x128xbf16>
    %15 = tpu.iota {dimensions = array<i32: 1>} : vector<8x128xi32>
    %16 = vector.extract_strided_slice %0 {offsets = [0, 2], sizes = [8, 1], strides = [1, 1]} : vector<8x8xi32> to vector<8x1xi32>
    %17 = vector.broadcast %16 : vector<8x1xi32> to vector<8x128xi32>
    %18 = arith.cmpi eq, %17, %15 : vector<8x128xi32>
    %19 = arith.extui %18 : vector<8x128xi1> to vector<8x128xi32>
    %20 = arith.sitofp %19 : vector<8x128xi32> to vector<8x128xf32>
    %21 = arith.truncf %20 : vector<8x128xf32> to vector<8x128xbf16>
    %22 = tpu.iota {dimensions = array<i32: 1>} : vector<8x128xi32>
    %23 = vector.extract_strided_slice %0 {offsets = [0, 3], sizes = [8, 1], strides = [1, 1]} : vector<8x8xi32> to vector<8x1xi32>
    %24 = vector.broadcast %23 : vector<8x1xi32> to vector<8x128xi32>
    %25 = arith.cmpi eq, %24, %22 : vector<8x128xi32>
    %26 = arith.extui %25 : vector<8x128xi1> to vector<8x128xi32>
    %27 = arith.sitofp %26 : vector<8x128xi32> to vector<8x128xf32>
    %28 = arith.truncf %27 : vector<8x128xf32> to vector<8x128xbf16>
    %29 = tpu.iota {dimensions = array<i32: 1>} : vector<8x128xi32>
    %30 = vector.extract_strided_slice %0 {offsets = [0, 4], sizes = [8, 1], strides = [1, 1]} : vector<8x8xi32> to vector<8x1xi32>
    %31 = vector.broadcast %30 : vector<8x1xi32> to vector<8x128xi32>
    %32 = arith.cmpi eq, %31, %29 : vector<8x128xi32>
    %33 = arith.extui %32 : vector<8x128xi1> to vector<8x128xi32>
    %34 = arith.sitofp %33 : vector<8x128xi32> to vector<8x128xf32>
    %35 = arith.truncf %34 : vector<8x128xf32> to vector<8x128xbf16>
    %36 = tpu.concatenate %7, %14, %21, %28, %35 in 1 : vector<8x128xbf16>, vector<8x128xbf16>, vector<8x128xbf16>, vector<8x128xbf16>, vector<8x128xbf16> -> vector<8x640xbf16>
    %c0_1 = arith.constant 0 : index
    %c0_2 = arith.constant 0 : index
    %37 = vector.load %arg2[%c0_1, %c0_2] : memref<640x128xbf16, #tpu.memory_space<vmem>>, vector<640x128xbf16>
    %cst = arith.constant dense<0.000000e+00> : vector<8x128xf32>
    %38 = tpu.matmul %36, %37, %cst {dimension_numbers = #tpu.dot_dimension_numbers<[1], [0], [0], [1], [0, 0, 1, 1], [], []>} : vector<8x640xbf16>, vector<640x128xbf16>, vector<8x128xf32> -> vector<8x128xf32>
    %c0_3 = arith.constant 0 : index
    %c0_4 = arith.constant 0 : index
    %39 = vector.load %arg3[%c0_3, %c0_4] : memref<8x128xf32, #tpu.memory_space<vmem>>, vector<8x128xf32>
    tpu.vector_store %arg3[%c0_3, %c0_4], %38 {strides = array<i32>} : memref<8x128xf32, #tpu.memory_space<vmem>>, vector<8x128xf32>,
    return
  }
  func.func @transform_0(%arg0: i32) -> (i32, i32) {
    %c0_i32 = arith.constant 0 : i32
    %c0_i32_0 = arith.constant 0 : i32
    return %arg0, %c0_i32 : i32, i32
  }
  func.func @transform_1(%arg0: i32) -> (i32, i32) {
    %c0_i32 = arith.constant 0 : i32
    %c0_i32_0 = arith.constant 0 : i32
    %c0_i32_1 = arith.constant 0 : i32
    return %c0_i32, %c0_i32_0 : i32, i32
  }
  func.func @transform_2(%arg0: i32) -> (i32, i32) {
    %c0_i32 = arith.constant 0 : i32
    %c0_i32_0 = arith.constant 0 : i32
    return %arg0, %c0_i32 : i32, i32
  }
}

</mosaic_0001>

<bundles_post_ra>
// kernel: encoder_block_forward.1
= control target key start
LH: loop header
LB: loop body
LE: loop exit
PB: predicated region body
PF: predicated region fallthrough
CT: control target
= control target key end

     0   :  { %7 = vsyncpa [#allocation3], 0  ;;  %s977_s9 = smov 0   ;;  %s1023_s0 = inlined_call_operand.vmem [shape: s32[16,8], index: 0, kind: input, shape index: {}]   ;;  %s1024_s1 = inlined_call_operand.hbm [shape: bf16[640,128], index: 1, kind: input, shape index: {}]   ;;  %s1025_s2 = inlined_call_operand.vmem [shape: f32[16,128], index: 2, kind: output, shape index: {}]  }
   0x1 LB: > { %s983_s10 = sadd.s32 4294967295, %s949_s9   ;;  %p701_p0 = scmp.ge.s32.totalorder %s949_s9, 1  ;;  %s949_s9 = sphi %s977_s9, %s13_s9  }
   0x2   : > { %p91_p1 = scmp.lt.s32.totalorder %s949_s9, 3  ;;  %s951_s11 = smov [#allocation2]  }
   0x3   : > { %s103_s12 = sshll.u32 %s951_s11, 4  ;;  %p846_p3 = scmp.eq.s32.totalorder %s983_s10, 0  ;;  %s104_s12 = int_to_ptr.vmem [resolvable:$true] %s103_s12 }
   0x4   : > { %p987_p2 = pnand %p701_p0, %p91_p1  ;;  %s924_s14 = scalar_lea.vmem %s104_s12, 5120 }
   0x5   : > { %p925_p7 = scmp.ne.s32.totalorder %s104_s12, %s924_s14  ;;  %p932_p10 = scmp.lt.s32.totalorder %s104_s12, %s104_s12 }
   0x6   : > { %p842_p4 = pneg %p987_p2  ;;  %p933_p11 = scmp.lt.s32.totalorder %s924_s14, %s924_s14 }
   0x8   : > { %p843_p5 = pnand %p846_p3, %p842_p4  ;;  %p934_p12 = por %p933_p11, %p932_p10 }
   0xa   : > { %p915_p6 = pneg %p843_p5 }
   0xc   : > { %p927_p8 = pnand %p925_p7, %p915_p6 }
   0xe   : > { %p928_p9 = pneg %p927_p8 }
  0x10   : > { %p935_p13 = pnand %p934_p12, %p928_p9 }
  0x12   : > { %938 = shalt.err (!%p935_p13)
}
  0x13   : > { %s952_s15 = smov 64   ;;  %s953_s16 = smov 4  }
  0x14   : > { %845 = dma.hbm_to_vmem [thread:$0]  (!%p843_p5), %s1024_s1, 5120, %s104_s12, [#allocation3], %s952_s15, %s952_s15, %s953_s16  }
  0x15   : > { %126 = sbr.rel (%p987_p2) target bundleno = 396 (0x18c), region = 28 }
  0x1a   : > { %944 = dma.done.wait (%p846_p3), [#allocation3], 5120  }
  0x1b   : > { %946 = vsyncadd (%p846_p3), [#allocation3], 4294962176  ;;  %p146_p0 = scmp.lt.s32.totalorder %s983_s10, 1  ;;  %v954_v0 = vmov 3   ;;  %v955_v1 = vmov 1   ;;  %v873_v3 = vld [vmem:[#allocation2 + $0x78] sm:$0xff]   ;;  %v156_v39 = vlaneseq }
  0x1c   : > { %869 = vset.pattern.permute.xlu1 %v954_v0  ;;  %867 = vset.pattern.permute.xlu0 %v955_v1  ;;  %v874_v4 = vld [vmem:[#allocation2 + $0x38] sm:$0xff]   ;;  %v956_v7 = vmov 2   ;;  %v957_v8 = vmov 0   ;;  %v877_v9 = vld [vmem:[#allocation2 + $0x70] sm:$0xff]   ;;  %v881_v13 = vld [vmem:[#allocation2 + $0x68] sm:$0xff]   ;;  %v958_v14 = vmov 4  }
  0x1d   : > { %s1028_s10 = smov (!%p146_p0, %s983_s10), 1  ;;  %765 = vmatprep.subr.bf16.mxu0 %v873_v3  ;;  %v875_v5 = vld [vmem:[#allocation2 + $0xf8] sm:$0xff]   ;;  %v878_v10 = vld [vmem:[#allocation2 + $0x30] sm:$0xff]   ;;  %v882_v15 = vld [vmem:[#allocation2 + $0x28] sm:$0xff]   ;;  %v959_v38 = vmov 0.0   ;;  %v157_v40 = vand.u32 127, %v156_v39 }
  0x1e   : > { %s706_s19 = sshll.u32 %s1028_s10, 3  ;;  %766 = vmatpush3.bf16.msra.mxu0 %v874_v4  ;;  %v876_v6 = vld [vmem:[#allocation2 + $0xb8] sm:$0xff]   ;;  %787 = vmatprep.subr.bf16.mxu1 %v875_v5  ;;  %v879_v11 = vld [vmem:[#allocation2 + $0xf0] sm:$0xff]   ;;  %v883_v16 = vld [vmem:[#allocation2 + $0xe8] sm:$0xff]   ;;  %v960_v43 = vmov 1.0|1.0  }
  0x1f   : > { %s149_s22 = scalar_lea.vmem %s1023_s0, %s706_s19  ;;  %767 = vmatprep.subr.bf16.mxu0 %v877_v9  ;;  %788 = vmatpush3.bf16.msra.mxu1 %v876_v6  ;;  %v880_v12 = vld [vmem:[#allocation2 + $0xb0] sm:$0xff]   ;;  %v884_v17 = vld [vmem:[#allocation2 + $0xa8] sm:$0xff]   ;;  %v885_v18 = vld [vmem:[#allocation2 + $0x60] sm:$0xff]   ;;  %vm961_vm8 = vmmov 0   ;;  %s153_s25 = scalar_lea.vmem %s1025_s2, %s706_s19 }
  0x20   : > { %v155_v2 = vld [vmem:[%s149_s22] sm:$0xff]  ;;  %789 = vmatprep.subr.bf16.mxu1 %v879_v11  ;;  %v889_v22 = vld [vmem:[#allocation2 + $0x58] sm:$0xff]   ;;  %v893_v26 = vld [vmem:[#allocation2 + $0x50] sm:$0xff]  }
  0x21   : > { %180 = vperm.xlu1 %869, %v155_v2   ;;  %166 = vperm.xlu0 %867, %v155_v2   ;;  %v886_v19 = vld [vmem:[#allocation2 + $0x20] sm:$0xff]   ;;  %v890_v23 = vld [vmem:[#allocation2 + $0x18] sm:$0xff]   ;;  %v894_v27 = vld [vmem:[#allocation2 + $0x10] sm:$0xff]  }
  0x22   : > { %768 = vmatpush3.bf16.msra.mxu0 %v878_v10  ;;  %v887_v20 = vld [vmem:[#allocation2 + $0xe0] sm:$0xff]   ;;  %v891_v24 = vld [vmem:[#allocation2 + $0xd8] sm:$0xff]   ;;  %v895_v28 = vld [vmem:[#allocation2 + $0xd0] sm:$0xff]  }
  0x23   : > { %769 = vmatprep.subr.bf16.mxu0 %v881_v13  ;;  %790 = vmatpush3.bf16.msra.mxu1 %v880_v12  ;;  %v888_v21 = vld [vmem:[#allocation2 + $0xa0] sm:$0xff]   ;;  %v892_v25 = vld [vmem:[#allocation2 + $0x98] sm:$0xff]   ;;  %v896_v29 = vld [vmem:[#allocation2 + $0x90] sm:$0xff]  }
  0x24   : > { %791 = vmatprep.subr.bf16.mxu1 %v883_v16  ;;  %v897_v30 = vld [vmem:[#allocation2 + $0x48] sm:$0xff]   ;;  %v901_v34 = vld [vmem:[#allocation2 + $0x40] sm:$0xff]   ;;  %v905_v46 = vld [vmem:[#allocation2 + $0x138] sm:$0xff]  }
  0x25   : > { %870 = vset.pattern.permute.xlu1 %v956_v7  ;;  %868 = vset.pattern.permute.xlu0 %v957_v8  ;;  %v898_v31 = vld [vmem:[#allocation2 + $0x8] sm:$0xff]   ;;  %v902_v35 = vld [vmem:[#allocation2] sm:$0xff]   ;;  %v906_v47 = vld [vmem:[#allocation2 + $0x130] sm:$0xff]  }
  0x26   : > { %173 = vperm.xlu1 %870, %v155_v2   ;;  %159 = vperm.xlu0 %868, %v155_v2   ;;  %v899_v32 = vld [vmem:[#allocation2 + $0xc8] sm:$0xff]   ;;  %v903_v36 = vld [vmem:[#allocation2 + $0xc0] sm:$0xff]   ;;  %v909_v50 = vld [vmem:[#allocation2 + $0x118] sm:$0xff]  }
  0x27   : > { %770 = vmatpush3.bf16.msra.mxu0 %v882_v15  ;;  %792 = vmatpush3.bf16.msra.mxu1 %v884_v17  ;;  %v900_v33 = vld [vmem:[#allocation2 + $0x88] sm:$0xff]   ;;  %v904_v37 = vld [vmem:[#allocation2 + $0x80] sm:$0xff]   ;;  %v910_v51 = vld [vmem:[#allocation2 + $0x110] sm:$0xff]  }
  0x28   : > { %771 = vmatprep.subr.bf16.mxu0 %v885_v18  ;;  %793 = vmatprep.subr.bf16.mxu1 %v887_v20  ;;  %v907_v48 = vld [vmem:[#allocation2 + $0x128] sm:$0xff]   ;;  %v908_v49 = vld [vmem:[#allocation2 + $0x120] sm:$0xff]  }
  0x29   : > { %v911_v52 = vld [vmem:[#allocation2 + $0x108] sm:$0xff]   ;;  %v912_v54 = vld [vmem:[#allocation2 + $0x100] sm:$0xff]  }
  0x2a   : > { %871 = vset.pattern.permute.xlu1 %v958_v14  ;;  %872 = vset.pattern.permute.xlu0 %v958_v14 }
  0x2b   : > { %187 = vperm.xlu1 %871, %v155_v2   ;;  %772 = vmatpush3.bf16.msra.mxu0 %v886_v19 }
  0x2c   : > { %773 = vmatprep.subr.bf16.mxu0 %v889_v22  ;;  %794 = vmatpush3.bf16.msra.mxu1 %v888_v21 }
  0x2d   : > { %795 = vmatprep.subr.bf16.mxu1 %v891_v24 }
  0x2f   : > { %774 = vmatpush3.bf16.msra.mxu0 %v890_v23 }
  0x30   : > { %775 = vmatprep.subr.bf16.mxu0 %v893_v26  ;;  %796 = vmatpush3.bf16.msra.mxu1 %v892_v25 }
  0x31   : > { %797 = vmatprep.subr.bf16.mxu1 %v895_v28 }
  0x33   : > { %776 = vmatpush3.bf16.msra.mxu0 %v894_v27 }
  0x34   : > { %777 = vmatprep.subr.bf16.mxu0 %v897_v30  ;;  %798 = vmatpush3.bf16.msra.mxu1 %v896_v29 }
  0x35   : > { %799 = vmatprep.subr.bf16.mxu1 %v899_v32 }
  0x37   : > { %778 = vmatpush3.bf16.msra.mxu0 %v898_v31 }
  0x38   : > { %779 = vmatprep.subr.bf16.mxu0 %v901_v34  ;;  %800 = vmatpush3.bf16.msra.mxu1 %v900_v33 }
  0x39   : > { %801 = vmatprep.subr.bf16.mxu1 %v903_v36 }
  0x3b   : > { %780 = vmatpush3.bf16.msra.mxu0 %v902_v35 }
  0x3c   : > { %818 = vmatprep.subr.bf16.mxu0 %v959_v38  ;;  %802 = vmatpush3.bf16.msra.mxu1 %v904_v37 }
  0x9c   : > { %v167_v41 = vpop.permute.xlu0 %166  ;;  %v181_v42 = vpop.permute.xlu1 %180 }
  0x9d   : > { %vm168_vm0 = vcmp.eq.s32.totalorder %v167_v41, %v157_v40  ;;  %vm182_vm1 = vcmp.eq.s32.totalorder %v181_v42, %v157_v40 }
  0x9e   : > { %vm753_vm2 = vmpackc.low %vm168_vm0, %vm168_vm0 }
  0x9f   : > { %754 = vmatprep.mubr.msk.bf16.mxu0 %vm753_vm2, %v960_v43  ;;  %vm757_vm3 = vmpackc.low %vm182_vm1, %vm182_vm1 }
  0xa0   : > { %758 = vmatprep.mubr.msk.bf16.mxu1 %vm757_vm3, %v960_v43 }
  0xa1   : > { %v174_v44 = vpop.permute.xlu1 %173  ;;  %v160_v45 = vpop.permute.xlu0 %159 }
  0xa2   : > { %vm175_vm4 = vcmp.eq.s32.totalorder %v174_v44, %v157_v40  ;;  %vm161_vm5 = vcmp.eq.s32.totalorder %v160_v45, %v157_v40 }
  0xa3   : > { %vm759_vm6 = vmpackc.low %vm175_vm4, %vm175_vm4 }
  0xa4   : > { %vm755_vm7 = vmpackc.low %vm161_vm5, %vm161_vm5  ;;  %760 = vmatmul.mubr.msk.bf16.vlgmr.msra.gmra.mxu1 %vm759_vm6, %v960_v43 }
  0xa5   : > { %756 = vmatmul.mubr.msk.bf16.vlgmr.msra.gmra.mxu0 %vm755_vm7, %v960_v43 }
  0xa6   : > { %819 = vmatpush3.bf16.msra.mxu0 %v905_v46  ;;  %834 = vmatprep.mubr.msk.bf16.mxu0 %vm961_vm8, %v959_v38  ;;  %v188_v53 = vpop.permute.xlu1 %187 }
  0xa7   : > { %820 = vmatprep.subr.bf16.mxu0 %v959_v38  ;;  %vm189_vm9 = vcmp.eq.s32.totalorder %v188_v53, %v157_v40 }
  0xa8   : > { %vm761_vm10 = vmpackc.low %vm189_vm9, %vm189_vm9 }
  0xaa   : > { %821 = vmatpush3.bf16.msra.mxu0 %v906_v47 }
  0xab   : > { %822 = vmatprep.subr.bf16.mxu0 %v959_v38 }
  0xae   : > { %823 = vmatpush3.bf16.msra.mxu0 %v907_v48 }
  0xaf   : > { %824 = vmatprep.subr.bf16.mxu0 %v959_v38 }
  0xb2   : > { %825 = vmatpush3.bf16.msra.mxu0 %v908_v49 }
  0xb3   : > { %826 = vmatprep.subr.bf16.mxu0 %v959_v38 }
  0xb6   : > { %827 = vmatpush3.bf16.msra.mxu0 %v909_v50 }
  0xb7   : > { %828 = vmatprep.subr.bf16.mxu0 %v959_v38 }
  0xba   : > { %829 = vmatpush3.bf16.msra.mxu0 %v910_v51 }
  0xbb   : > { %830 = vmatprep.subr.bf16.mxu0 %v959_v38 }
  0xbe   : > { %831 = vmatpush3.bf16.msra.mxu0 %v911_v52 }
  0xbf   : > { %832 = vmatprep.subr.bf16.mxu0 %v959_v38 }
  0xc2   : > { %833 = vmatpush3.bf16.msra.mxu0 %v912_v54 }
  0xc5   : > { %835 = vmatmul.mubr.msk.bf16.vlgmr.msra.gmra.mxu0 %vm761_vm10, %v960_v43 }
 0x164   : > { %v803_v55 = vpop.f32.mrf.mxu1 }
 0x165   : > { %v781_v56 = vpop.f32.mrf.mxu0 }
 0x166   : > { %v804_v57 = vpop.f32.mrf.mxu1 }
 0x167   : > { %v782_v58 = vpop.f32.mrf.mxu0  ;;  %v805_v0 = vadd.f32 %v804_v57, %v803_v55 }
 0x168   : > { %v806_v59 = vpop.f32.mrf.mxu1  ;;  %v783_v63 = vadd.f32 %v782_v58, %v781_v56 }
 0x169   : > { %v784_v60 = vpop.f32.mrf.mxu0 }
 0x16a   : > { %v807_v61 = vpop.f32.mrf.mxu1  ;;  %v588_v1 = vadd.f32 %v805_v0, %v783_v63 }
 0x16b   : > { %v785_v62 = vpop.f32.mrf.mxu0 }
 0x185   : > { %v627_v2 = vpop.f32.mrf.mxu0 }
 0x186   : > { %v628_v3 = vadd.f32 %v627_v2, %v588_v1 }
 0x187   : > { %v836_v4 = vpop.f32.mrf.mxu0 }
 0x188   : > { %633 = vst [vmem:[%s153_s25] sm:$0xff] %v628_v3 }
 0x189   : > { %v630_v5 = vpop.f32.mrf.mxu0 }
 0x18b   : > { %v837_v6 = vpop.f32.mrf.mxu0 }
 0x18c PF: > { %s13_s9 = sadd.s32 1, %s949_s9  }
 0x18d   : > { %p10_p1 = scmp.ge.s32.totalorder %s13_s9, 4  }
 0x18f   :  { %12 = sbr.rel (!%p10_p1) target bundleno = 1 (0x1), region = 63 }
 0x194   :  { %653 = vsyncpa [#allocation3], 1 }
 0x195   :  { %655 = vsyncpa [#allocation3 + $0x1], 1 }

</bundles_post_ra>
